<compile_context>
chip_gen: v6e
topology: v6e:2x2x1
jax: 0.10.0
libtpu: 0.0.40
codegen_flags: <defaults>
</compile_context>

<pallas_src>
import math
import functools

import jax
import jax.numpy as jnp
from jax.experimental import pallas as pl
from jax.experimental.pallas import tpu as pltpu


_INV_SQRT2 = 1.0 / math.sqrt(2.0)


def _gelu_exact_f32(h):
    # Exact (erf-based) GELU in f32 -- matches torch.nn.GELU() default.
    return 0.5 * h * (1.0 + jax.lax.erf(h * jnp.float32(_INV_SQRT2)))


def _mlp_kernel_resident(x_ref, w1_ref, b1_ref, w2_ref, b2_ref, o_ref):
    """Resident-weight path: y = GELU(x @ W1 + b1) @ W2 + b2 for one row tile."""
    cdt = w1_ref.dtype
    x = x_ref[...].astype(cdt)                                 # in-kernel cast of x tile
    h = jnp.dot(x, w1_ref[...], preferred_element_type=jnp.float32)
    h = _gelu_exact_f32(h + b1_ref[...])                       # f32 bias + GELU
    y = jnp.dot(h.astype(cdt), w2_ref[...], preferred_element_type=jnp.float32)
    o_ref[...] = (y + b2_ref[...]).astype(o_ref.dtype)
    # Dropout (eval / p=0.0) is identity.


def _mlp_kernel_htiled(x_ref, w1_ref, b1_ref, w2_ref, b2_ref, o_ref, acc_ref):
    """Hidden-dim-tiled path: accumulate partial second matmul over h blocks."""
    cdt = w1_ref.dtype
    hi = pl.program_id(1)

    @pl.when(hi == 0)
    def _():
        acc_ref[...] = jnp.zeros_like(acc_ref)

    x = x_ref[...].astype(cdt)
    h = jnp.dot(x, w1_ref[...], preferred_element_type=jnp.float32)
    h = _gelu_exact_f32(h + b1_ref[...])
    acc_ref[...] += jnp.dot(h.astype(cdt), w2_ref[...], preferred_element_type=jnp.float32)

    @pl.when(hi == pl.num_programs(1) - 1)
    def _():
        o_ref[...] = (acc_ref[...] + b2_ref[...]).astype(o_ref.dtype)


def _round_up(x, m):
    return (x + m - 1) // m * m


def _pad2(a, r, c):
    if a.shape == (r, c):
        return a
    return jnp.pad(a, ((0, r - a.shape[0]), (0, c - a.shape[1])))


def _vmem_capacity_bytes():
    try:
        return int(pltpu.get_tpu_info().vmem_capacity_bytes)
    except Exception:
        return 64 * 1024 * 1024        # conservative (v7x per-TC VMEM)


@functools.partial(jax.jit, static_argnames=("tm", "th", "compute_dtype", "path"))
def mlp_pallas(x, w1, b1, w2, b2, *, tm=256, th=None,
               compute_dtype=jnp.bfloat16, path="auto"):
    """x: (B, T, C). w1: (C, H), b1: (H,), w2: (H, C), b2: (C,), H = 4*C.

    compute_dtype sets the matmul *operand* dtype (default bfloat16 -- native MXU dtype on all
    generations); accumulation, bias add and GELU stay f32.  Pass jnp.float32 for the exact path.
    path: "auto" (VMEM-capacity based), "resident", or "htiled".
    """
    B, T, C = x.shape
    H = w1.shape[1]
    M = B * T
    out_dtype = x.dtype
    cdt = jnp.dtype(compute_dtype)
    isz = cdt.itemsize
    xsz = jnp.dtype(x.dtype).itemsize
    osz = jnp.dtype(out_dtype).itemsize

    # Lane-dense feature / hidden dims: pad to multiples of 128 (zero padding is exact; it is a
    # no-op at production widths and avoids masked vst.msk partial stores for toy widths).
    Cp = _round_up(C, 128)
    Hp = _round_up(H, 128)

    # Row tile aligned to the compute dtype's sublane packing (f32: 8, bf16: 16, 8-bit: 32).
    packing = max(8, 32 // isz)
    tm_eff = max(packing, min(_round_up(int(tm), packing), _round_up(M, packing)))
    M_pad = _round_up(M, tm_eff)
    steps_m = M_pad // tm_eff
    # v7x megacore balance: prefer an even number of row steps so both TensorCores stay busy.
    if steps_m > 1 and steps_m % 2 == 1:
        tm_half = (tm_eff // 2) // packing * packing
        if tm_half >= packing and pl.cdiv(M, tm_half) % 2 == 0:
            tm_eff = tm_half
            M_pad = _round_up(M, tm_eff)
            steps_m = M_pad // tm_eff

    vmem_budget = int(0.85 * _vmem_capacity_bytes())   # leave headroom for Mosaic scratch

    # Resident-path VMEM footprint: single-buffered weights/biases, double-buffered x/out tiles,
    # f32 hidden slab + its compute-dtype cast copy + f32 y tile.
    resident_need = (
        2 * Cp * Hp * isz + (Hp + Cp) * 4
        + 2 * tm_eff * Cp * xsz
        + 2 * tm_eff * Cp * osz
        + tm_eff * Hp * (4 + isz)
        + tm_eff * Cp * 4
    )
    if path == "resident":
        use_resident = True
    elif path == "htiled":
        use_resident = False
    else:
        use_resident = int(resident_need * 1.25) <= vmem_budget

    # Operand prep: weights cast once to the matmul operand dtype (halves their HBM/DMA bytes on
    # the streamed path); x stays in its own dtype and is cast inside the kernel.
    x2 = x.reshape(M, C)
    if (M_pad, Cp) != (M, C):
        x2 = jnp.pad(x2, ((0, M_pad - M), (0, Cp - C)))
    w1c = _pad2(w1, Cp, Hp).astype(cdt)
    w2c = _pad2(w2, Hp, Cp).astype(cdt)
    b1p = _pad2(b1.reshape(1, H), 1, Hp).astype(jnp.float32)
    b2p = _pad2(b2.reshape(1, C), 1, Cp).astype(jnp.float32)

    resident_spec = pl.Buffered(1)   # constant index_map -> no double-buffering needed

    if use_resident:
        vmem_limit = int(min(max(resident_need * 3 // 2, 32 * 1024 * 1024), vmem_budget))
        cost = pl.CostEstimate(
            flops=4 * M * C * H,
            transcendentals=M * H,
            bytes_accessed=(M_pad * Cp * xsz + 2 * Cp * Hp * isz
                            + (Hp + Cp) * 4 + M_pad * Cp * osz),
        )
        out = pl.pallas_call(
            _mlp_kernel_resident,
            out_shape=jax.ShapeDtypeStruct((M_pad, Cp), out_dtype),
            grid_spec=pltpu.PrefetchScalarGridSpec(
                num_scalar_prefetch=0,
                grid=(steps_m,),
                in_specs=[
                    pl.BlockSpec((tm_eff, Cp), lambda i: (i, 0)),                            # x rows
                    pl.BlockSpec((Cp, Hp), lambda i: (0, 0), pipeline_mode=resident_spec),   # W1
                    pl.BlockSpec((1, Hp), lambda i: (0, 0), pipeline_mode=resident_spec),    # b1
                    pl.BlockSpec((Hp, Cp), lambda i: (0, 0), pipeline_mode=resident_spec),   # W2
                    pl.BlockSpec((1, Cp), lambda i: (0, 0), pipeline_mode=resident_spec),    # b2
                ],
                out_specs=pl.BlockSpec((tm_eff, Cp), lambda i: (i, 0)),
            ),
            compiler_params=pltpu.CompilerParams(
                dimension_semantics=("parallel",),      # row axis shards across v7x TCs
                vmem_limit_bytes=vmem_limit,
            ),
            cost_estimate=cost,
        )(x2, w1c, b1p, w2c, b2p)
    else:
        # Hidden-dim tile: multiple of 128 (lane dim of W1 block, sublane dim of W2 block).
        if th is None:
            th_eff = 128
            for cand in (1024, 512, 256):
                if Hp % cand == 0:
                    th_eff = cand
                    break
        else:
            th_eff = int(th)
        assert Hp % th_eff == 0 and th_eff % 128 == 0, \
            "th must divide padded H and be a multiple of 128"
        steps_h = Hp // th_eff

        htiled_need = (
            2 * (Cp * th_eff + th_eff * Cp) * isz     # double-buffered W1/W2 tiles
            + 2 * th_eff * 4 + Cp * 4                 # b1 tiles + resident b2
            + 2 * tm_eff * Cp * xsz                   # x tile (double-buffered)
            + 2 * tm_eff * Cp * osz                   # out tile
            + tm_eff * Cp * 4                         # f32 accumulator scratch
            + tm_eff * th_eff * (4 + isz)             # f32 hidden slab + cast copy
        )
        vmem_limit = int(min(max(htiled_need * 3 // 2, 32 * 1024 * 1024), vmem_budget))
        cost = pl.CostEstimate(
            flops=4 * M * C * H,
            transcendentals=M * H,
            bytes_accessed=(M_pad * Cp * xsz + steps_m * 2 * Cp * Hp * isz
                            + (Hp + Cp) * 4 + M_pad * Cp * osz),
        )
        out = pl.pallas_call(
            _mlp_kernel_htiled,
            out_shape=jax.ShapeDtypeStruct((M_pad, Cp), out_dtype),
            grid_spec=pltpu.PrefetchScalarGridSpec(
                num_scalar_prefetch=0,
                grid=(steps_m, steps_h),
                in_specs=[
                    pl.BlockSpec((tm_eff, Cp), lambda i, h: (i, 0)),                          # x rows
                    pl.BlockSpec((Cp, th_eff), lambda i, h: (0, h)),                          # W1 cols
                    pl.BlockSpec((1, th_eff), lambda i, h: (0, h)),                           # b1 slice
                    pl.BlockSpec((th_eff, Cp), lambda i, h: (h, 0)),                          # W2 rows
                    pl.BlockSpec((1, Cp), lambda i, h: (0, 0), pipeline_mode=resident_spec),  # b2
                ],
                out_specs=pl.BlockSpec((tm_eff, Cp), lambda i, h: (i, 0)),
                scratch_shapes=[pltpu.VMEM((tm_eff, Cp), jnp.float32)],
            ),
            compiler_params=pltpu.CompilerParams(
                dimension_semantics=("parallel", "arbitrary"),
                vmem_limit_bytes=vmem_limit,
            ),
            cost_estimate=cost,
        )(x2, w1c, b1p, w2c, b2p)

    return out[:M, :C].reshape(B, T, C)


def _mlp_reference(x, w1, b1, w2, b2):
    h = x @ w1 + b1
    h = 0.5 * h * (1.0 + jax.lax.erf(h * jnp.float32(_INV_SQRT2)))
    return h @ w2 + b2


if __name__ == "__main__":
    key = jax.random.PRNGKey(0)

    def make_params(k, C):
        H = 4 * C
        kw1, kb1, kw2, kb2 = jax.random.split(k, 4)
        bound1 = 1.0 / math.sqrt(C)
        w1 = jax.random.uniform(kw1, (C, H), jnp.float32, -bound1, bound1)   # (in, out)
        b1 = jax.random.uniform(kb1, (H,), jnp.float32, -bound1, bound1)
        bound2 = 1.0 / math.sqrt(H)
        w2 = jax.random.uniform(kw2, (H, C), jnp.float32, -bound2, bound2)   # (in, out)
        b2 = jax.random.uniform(kb2, (C,), jnp.float32, -bound2, bound2)
        return w1, b1, w2, b2

    # Config: n_embed=32, dropout=0.0 (identity), batch=2, seq=8.
    B, T, C = 2, 8, 32
    kp, kx, kx2, kp2, kx3 = jax.random.split(key, 5)
    w1, b1, w2, b2 = make_params(kp, C)
    x = jax.random.normal(kx, (B, T, C), dtype=jnp.float32)
    y_ref = _mlp_reference(x, w1, b1, w2, b2)

    # 1) Exact f32-operand path (resident weights); tight tolerance.
    y = jax.block_until_ready(mlp_pallas(x, w1, b1, w2, b2, compute_dtype=jnp.float32))
    assert y.shape == (B, T, C)
    assert jnp.allclose(y, y_ref, atol=1e-5, rtol=1e-5), "f32 mismatch vs reference"

    # 2) Default bf16 matmul-operand perf path; loose tolerance by design.
    y_bf16 = jax.block_until_ready(mlp_pallas(x, w1, b1, w2, b2))
    assert jnp.allclose(y_bf16, y_ref, atol=5e-2, rtol=5e-2), "bf16 path too far off"

    # 3) Row count not aligned to packing -> exercises the row/feature padding path.
    x_odd = jax.random.normal(kx2, (2, 9, C), dtype=jnp.float32)
    y_odd = jax.block_until_ready(mlp_pallas(x_odd, w1, b1, w2, b2, compute_dtype=jnp.float32))
    assert jnp.allclose(y_odd, _mlp_reference(x_odd, w1, b1, w2, b2),
                        atol=1e-5, rtol=1e-5), "padded-path mismatch"

    # 4) Forced H-tiled accumulator path (multiple hidden-dim grid steps), exact operands.
    C2 = 64
    w1b, b1b, w2b, b2b = make_params(kp2, C2)
    xb = jax.random.normal(kx3, (2, 8, C2), dtype=jnp.float32)
    y_ht = jax.block_until_ready(
        mlp_pallas(xb, w1b, b1b, w2b, b2b, compute_dtype=jnp.float32, path="htiled", th=128))
    assert jnp.allclose(y_ht, _mlp_reference(xb, w1b, b1b, w2b, b2b),
                        atol=1e-4, rtol=1e-4), "H-tiled path mismatch"

    print("KERNEL_OK")
</pallas_src>

<mosaic_0001>
module attributes {stable_mosaic.version = 11 : i64} {
  func.func @_mlp_kernel_resident(%arg0: i32, %arg1: memref<16x128xf32, #tpu.memory_space<vmem>>, %arg2: memref<128x128xf32, #tpu.memory_space<vmem>>, %arg3: memref<1x128xf32, #tpu.memory_space<vmem>>, %arg4: memref<128x128xf32, #tpu.memory_space<vmem>>, %arg5: memref<1x128xf32, #tpu.memory_space<vmem>>, %arg6: memref<16x128xf32, #tpu.memory_space<vmem>>) attributes {dimension_semantics = [#tpu.dimension_semantics<parallel>], iteration_bounds = array<i64: 1>, scalar_prefetch = 0 : i64, scratch_operands = 0 : i64, tpu.core_type = #tpu.core_type<tc>, window_params = [{transform_indices = @transform_0, window_bounds = array<i64: 16, 128>}, {pipeline_mode = #tpu.pipeline_mode<synchronous>, transform_indices = @transform_1, window_bounds = array<i64: 128, 128>}, {pipeline_mode = #tpu.pipeline_mode<synchronous>, transform_indices = @transform_2, window_bounds = array<i64: 1, 128>}, {pipeline_mode = #tpu.pipeline_mode<synchronous>, transform_indices = @transform_3, window_bounds = array<i64: 128, 128>}, {pipeline_mode = #tpu.pipeline_mode<synchronous>, transform_indices = @transform_4, window_bounds = array<i64: 1, 128>}, {transform_indices = @transform_5, window_bounds = array<i64: 16, 128>}]} {
    %c0 = arith.constant 0 : index
    %c0_0 = arith.constant 0 : index
    %0 = vector.load %arg1[%c0, %c0_0] : memref<16x128xf32, #tpu.memory_space<vmem>>, vector<16x128xf32>
    %c0_1 = arith.constant 0 : index
    %c0_2 = arith.constant 0 : index
    %1 = vector.load %arg2[%c0_1, %c0_2] : memref<128x128xf32, #tpu.memory_space<vmem>>, vector<128x128xf32>
    %cst = arith.constant dense<0.000000e+00> : vector<16x128xf32>
    %2 = tpu.matmul %0, %1, %cst {dimension_numbers = #tpu.dot_dimension_numbers<[1], [0], [0], [1], [0, 0, 1, 1], [], []>} : vector<16x128xf32>, vector<128x128xf32>, vector<16x128xf32> -> vector<16x128xf32>
    %c0_3 = arith.constant 0 : index
    %c0_4 = arith.constant 0 : index
    %3 = vector.load %arg3[%c0_3, %c0_4] : memref<1x128xf32, #tpu.memory_space<vmem>>, vector<1x128xf32>
    %4 = vector.broadcast %3 : vector<1x128xf32> to vector<16x128xf32>
    %5 = arith.addf %2, %4 : vector<16x128xf32>
    %cst_5 = arith.constant 5.000000e-01 : f32
    %6 = vector.broadcast %cst_5 : f32 to vector<16x128xf32>
    %7 = arith.mulf %6, %5 : vector<16x128xf32>
    %cst_6 = arith.constant 0.707106769 : f32
    %8 = vector.broadcast %cst_6 : f32 to vector<16x128xf32>
    %9 = arith.mulf %5, %8 : vector<16x128xf32>
    %10 = math.erf %9 : vector<16x128xf32>
    %cst_7 = arith.constant 1.000000e+00 : f32
    %11 = vector.broadcast %cst_7 : f32 to vector<16x128xf32>
    %12 = arith.addf %11, %10 : vector<16x128xf32>
    %13 = arith.mulf %7, %12 : vector<16x128xf32>
    %c0_8 = arith.constant 0 : index
    %c0_9 = arith.constant 0 : index
    %14 = vector.load %arg4[%c0_8, %c0_9] : memref<128x128xf32, #tpu.memory_space<vmem>>, vector<128x128xf32>
    %cst_10 = arith.constant dense<0.000000e+00> : vector<16x128xf32>
    %15 = tpu.matmul %13, %14, %cst_10 {dimension_numbers = #tpu.dot_dimension_numbers<[1], [0], [0], [1], [0, 0, 1, 1], [], []>} : vector<16x128xf32>, vector<128x128xf32>, vector<16x128xf32> -> vector<16x128xf32>
    %c0_11 = arith.constant 0 : index
    %c0_12 = arith.constant 0 : index
    %16 = vector.load %arg5[%c0_11, %c0_12] : memref<1x128xf32, #tpu.memory_space<vmem>>, vector<1x128xf32>
    %17 = vector.broadcast %16 : vector<1x128xf32> to vector<16x128xf32>
    %18 = arith.addf %15, %17 : vector<16x128xf32>
    %c0_13 = arith.constant 0 : index
    %c0_14 = arith.constant 0 : index
    %19 = vector.load %arg6[%c0_13, %c0_14] : memref<16x128xf32, #tpu.memory_space<vmem>>, vector<16x128xf32>
    tpu.vector_store %arg6[%c0_13, %c0_14], %18 {strides = array<i32>} : memref<16x128xf32, #tpu.memory_space<vmem>>, vector<16x128xf32>,
    return
  }
  func.func @transform_0(%arg0: i32) -> (i32, i32) {
    %c0_i32 = arith.constant 0 : i32
    %c0_i32_0 = arith.constant 0 : i32
    return %arg0, %c0_i32 : i32, i32
  }
  func.func @transform_1(%arg0: i32) -> (i32, i32) {
    %c0_i32 = arith.constant 0 : i32
    %c0_i32_0 = arith.constant 0 : i32
    %c0_i32_1 = arith.constant 0 : i32
    return %c0_i32, %c0_i32_0 : i32, i32
  }
  func.func @transform_2(%arg0: i32) -> (i32, i32) {
    %c0_i32 = arith.constant 0 : i32
    %c0_i32_0 = arith.constant 0 : i32
    %c0_i32_1 = arith.constant 0 : i32
    return %c0_i32, %c0_i32_0 : i32, i32
  }
  func.func @transform_3(%arg0: i32) -> (i32, i32) {
    %c0_i32 = arith.constant 0 : i32
    %c0_i32_0 = arith.constant 0 : i32
    %c0_i32_1 = arith.constant 0 : i32
    return %c0_i32, %c0_i32_0 : i32, i32
  }
  func.func @transform_4(%arg0: i32) -> (i32, i32) {
    %c0_i32 = arith.constant 0 : i32
    %c0_i32_0 = arith.constant 0 : i32
    %c0_i32_1 = arith.constant 0 : i32
    return %c0_i32, %c0_i32_0 : i32, i32
  }
  func.func @transform_5(%arg0: i32) -> (i32, i32) {
    %c0_i32 = arith.constant 0 : i32
    %c0_i32_0 = arith.constant 0 : i32
    return %arg0, %c0_i32 : i32, i32
  }
}

</mosaic_0001>

<bundles_post_ra>
// kernel: mlp_pallas.1
= control target key start
LH: loop header
LB: loop body
LE: loop exit
PB: predicated region body
PF: predicated region fallthrough
CT: control target
= control target key end

     0   :  { %s490_s1 = inlined_call_operand.vmem [shape: f32[128,128], index: 1, kind: input, shape index: {}]   ;;  %s491_s0 = inlined_call_operand.vmem [shape: f32[16,128], index: 0, kind: input, shape index: {}]   ;;  %s492_s3 = inlined_call_operand.vmem [shape: f32[128,128], index: 3, kind: input, shape index: {}]   ;;  %s493_s2 = inlined_call_operand.vmem [shape: f32[1,128], index: 2, kind: input, shape index: {}]   ;;  %s494_s4 = inlined_call_operand.vmem [shape: f32[1,128], index: 4, kind: input, shape index: {}]   ;;  %s495_s5 = inlined_call_operand.vmem [shape: f32[16,128], index: 5, kind: output, shape index: {}]  }
   0x1   :  { %v37_v0 = vld [vmem:[%s490_s1 + $0x78] sm:$0xff]  ;;  %v36_v1 = vld [vmem:[%s490_s1 + $0x70] sm:$0xff]  ;;  %v35_v2 = vld [vmem:[%s490_s1 + $0x68] sm:$0xff] }
   0x2   :  { %272 = vmatprep.subr.mxu0 %v37_v0  ;;  %v34_v3 = vld [vmem:[%s490_s1 + $0x60] sm:$0xff]  ;;  %v33_v5 = vld [vmem:[%s490_s1 + $0x58] sm:$0xff]  ;;  %v144_v7 = vld [vmem:[%s492_s3 + $0x70] sm:$0xff] }
   0x3   :  { %273 = vmatpush3.msra.mxu0 %v37_v0  ;;  %v20_v4 = vld [vmem:[%s491_s0] sm:$0xff]  ;;  %v145_v6 = vld [vmem:[%s492_s3 + $0x78] sm:$0xff]  ;;  %v32_v8 = vld [vmem:[%s490_s1 + $0x50] sm:$0xff] }
   0x4   :  { %274 = vmatprep.subr.mxu0 %v36_v1  ;;  %304 = vmatprep.mubr.f32.mxu0 %v20_v4  ;;  %v143_v9 = vld [vmem:[%s492_s3 + $0x68] sm:$0xff]  ;;  %v30_v11 = vld [vmem:[%s490_s1 + $0x40] sm:$0xff]  ;;  %v29_v12 = vld [vmem:[%s490_s1 + $0x38] sm:$0xff] }
   0x5   :  { %275 = vmatpush3.msra.mxu0 %v36_v1  ;;  %307 = vmatprep.subr.mxu1 %v145_v6  ;;  %v31_v10 = vld [vmem:[%s490_s1 + $0x48] sm:$0xff]  ;;  %v28_v13 = vld [vmem:[%s490_s1 + $0x30] sm:$0xff]  ;;  %v26_v15 = vld [vmem:[%s490_s1 + $0x20] sm:$0xff] }
   0x6   :  { %276 = vmatprep.subr.mxu0 %v35_v2  ;;  %308 = vmatpush3.msra.mxu1 %v145_v6  ;;  %v27_v14 = vld [vmem:[%s490_s1 + $0x28] sm:$0xff]  ;;  %v25_v16 = vld [vmem:[%s490_s1 + $0x18] sm:$0xff]  ;;  %v24_v17 = vld [vmem:[%s490_s1 + $0x10] sm:$0xff] }
   0x7   :  { %277 = vmatpush3.msra.mxu0 %v35_v2  ;;  %309 = vmatprep.subr.mxu1 %v144_v7  ;;  %v23_v18 = vld [vmem:[%s490_s1 + $0x8] sm:$0xff]  ;;  %v22_v19 = vld [vmem:[%s490_s1] sm:$0xff]  ;;  %v141_v22 = vld [vmem:[%s492_s3 + $0x58] sm:$0xff] }
   0x8   :  { %278 = vmatprep.subr.mxu0 %v34_v3  ;;  %310 = vmatpush3.msra.mxu1 %v144_v7  ;;  %v21_v20 = vld [vmem:[%s491_s0 + $0x8] sm:$0xff]  ;;  %v142_v21 = vld [vmem:[%s492_s3 + $0x60] sm:$0xff]  ;;  %v140_v23 = vld [vmem:[%s492_s3 + $0x50] sm:$0xff] }
   0x9   :  { %279 = vmatpush3.msra.mxu0 %v34_v3  ;;  %311 = vmatprep.subr.mxu1 %v143_v9  ;;  %v139_v24 = vld [vmem:[%s492_s3 + $0x48] sm:$0xff]  ;;  %v138_v25 = vld [vmem:[%s492_s3 + $0x40] sm:$0xff]  ;;  %v137_v26 = vld [vmem:[%s492_s3 + $0x38] sm:$0xff] }
   0xa   :  { %280 = vmatprep.subr.mxu0 %v33_v5  ;;  %312 = vmatpush3.msra.mxu1 %v143_v9  ;;  %v136_v27 = vld [vmem:[%s492_s3 + $0x30] sm:$0xff]  ;;  %v135_v28 = vld [vmem:[%s492_s3 + $0x28] sm:$0xff]  ;;  %v134_v29 = vld [vmem:[%s492_s3 + $0x20] sm:$0xff] }
   0xb   :  { %281 = vmatpush3.msra.mxu0 %v33_v5  ;;  %313 = vmatprep.subr.mxu1 %v142_v21  ;;  %v133_v30 = vld [vmem:[%s492_s3 + $0x18] sm:$0xff]  ;;  %v132_v31 = vld [vmem:[%s492_s3 + $0x10] sm:$0xff]  ;;  %v131_v32 = vld [vmem:[%s492_s3 + $0x8] sm:$0xff] }
   0xc   :  { %282 = vmatprep.subr.mxu0 %v32_v8  ;;  %314 = vmatpush3.msra.mxu1 %v142_v21  ;;  %v130_v33 = vld [vmem:[%s492_s3] sm:$0xff] }
   0xd   :  { %283 = vmatpush3.msra.mxu0 %v32_v8  ;;  %315 = vmatprep.subr.mxu1 %v141_v22  ;;  %v234_v34 = vld [vmem:[%s493_s2] ss:$0 sm:$0xff] }
   0xe   :  { %284 = vmatprep.subr.mxu0 %v31_v10  ;;  %316 = vmatpush3.msra.mxu1 %v141_v22  ;;  %v235_v49 = vld [vmem:[%s494_s4] ss:$0 sm:$0xff] }
   0xf   :  { %285 = vmatpush3.msra.mxu0 %v31_v10  ;;  %317 = vmatprep.subr.mxu1 %v140_v23 }
  0x10   :  { %286 = vmatprep.subr.mxu0 %v30_v11  ;;  %318 = vmatpush3.msra.mxu1 %v140_v23 }
  0x11   :  { %287 = vmatpush3.msra.mxu0 %v30_v11  ;;  %319 = vmatprep.subr.mxu1 %v139_v24 }
  0x12   :  { %288 = vmatprep.subr.mxu0 %v29_v12  ;;  %320 = vmatpush3.msra.mxu1 %v139_v24 }
  0x13   :  { %289 = vmatpush3.msra.mxu0 %v29_v12  ;;  %321 = vmatprep.subr.mxu1 %v138_v25 }
  0x14   :  { %290 = vmatprep.subr.mxu0 %v28_v13  ;;  %322 = vmatpush3.msra.mxu1 %v138_v25 }
  0x15   :  { %291 = vmatpush3.msra.mxu0 %v28_v13  ;;  %323 = vmatprep.subr.mxu1 %v137_v26 }
  0x16   :  { %292 = vmatprep.subr.mxu0 %v27_v14  ;;  %324 = vmatpush3.msra.mxu1 %v137_v26 }
  0x17   :  { %293 = vmatpush3.msra.mxu0 %v27_v14  ;;  %325 = vmatprep.subr.mxu1 %v136_v27 }
  0x18   :  { %294 = vmatprep.subr.mxu0 %v26_v15  ;;  %326 = vmatpush3.msra.mxu1 %v136_v27 }
  0x19   :  { %295 = vmatpush3.msra.mxu0 %v26_v15  ;;  %327 = vmatprep.subr.mxu1 %v135_v28 }
  0x1a   :  { %296 = vmatprep.subr.mxu0 %v25_v16  ;;  %328 = vmatpush3.msra.mxu1 %v135_v28 }
  0x1b   :  { %297 = vmatpush3.msra.mxu0 %v25_v16  ;;  %329 = vmatprep.subr.mxu1 %v134_v29 }
  0x1c   :  { %298 = vmatprep.subr.mxu0 %v24_v17  ;;  %330 = vmatpush3.msra.mxu1 %v134_v29 }
  0x1d   :  { %299 = vmatpush3.msra.mxu0 %v24_v17  ;;  %331 = vmatprep.subr.mxu1 %v133_v30 }
  0x1e   :  { %300 = vmatprep.subr.mxu0 %v23_v18  ;;  %332 = vmatpush3.msra.mxu1 %v133_v30 }
  0x1f   :  { %301 = vmatpush3.msra.mxu0 %v23_v18  ;;  %333 = vmatprep.subr.mxu1 %v132_v31 }
  0x20   :  { %302 = vmatprep.subr.mxu0 %v22_v19  ;;  %334 = vmatpush3.msra.mxu1 %v132_v31 }
  0x21   :  { %303 = vmatpush3.msra.mxu0 %v22_v19  ;;  %335 = vmatprep.subr.mxu1 %v131_v32 }
  0x22   :  { %305 = vmatmul.mubr.f32.vlgmr.msra.gmra.mxu0 %v21_v20  ;;  %336 = vmatpush3.msra.mxu1 %v131_v32 }
  0x23   :  { %337 = vmatprep.subr.mxu1 %v130_v33 }
  0x24   :  { %338 = vmatpush3.msra.mxu1 %v130_v33 }
  0xe2   :  { %v306_v35 = vpop.f32.mrf.mxu0 }
  0xe3   :  { %v117_v36 = vadd.f32 %v306_v35, %v234_v34 }
  0xe4   :  { %v111_v37 = vpop.f32.mrf.mxu0 }
  0xe5   :  { %v123_v38 = vmul.f32 0.70710677, %v117_v36  ;;  %v112_v39 = vadd.f32 %v234_v34, %v111_v37  ;;  %v121_v46 = vmul.f32 0.5, %v117_v36 }
  0xe7   :  { %342 = verf.f32 %v123_v38  ;;  %v122_v40 = vmul.f32 0.70710677, %v112_v39  ;;  %v120_v44 = vmul.f32 0.5, %v112_v39 }
  0xe9   :  { %344 = verf.f32 %v122_v40 }
  0xf4   :  { %v343_v41 = vpop.eup %342 }
  0xf5   :  { %v127_v43 = vadd.f32 1.0, %v343_v41 }
  0xf6   :  { %v345_v42 = vpop.eup %344 }
  0xf7   :  { %v126_v45 = vadd.f32 1.0, %v345_v42  ;;  %v129_v48 = vmul.f32 %v127_v43, %v121_v46 }
  0xf9   :  { %v128_v47 = vmul.f32 %v126_v45, %v120_v44 }
  0xfb   :  { %339 = vmatprep.mubr.f32.mxu1 %v128_v47 }
  0xfc   :  { %340 = vmatmul.mubr.f32.vlgmr.msra.gmra.mxu1 %v129_v48 }
 0x1bc   :  { %v341_v50 = vpop.f32.mrf.mxu1 }
 0x1bd   :  { %v225_v51 = vadd.f32 %v341_v50, %v235_v49 }
 0x1be   :  { %v219_v52 = vpop.f32.mrf.mxu1 }
 0x1bf   :  { %229 = vst [vmem:[%s495_s5 + $0x8] sm:$0xff] %v225_v51  ;;  %v220_v53 = vadd.f32 %v235_v49, %v219_v52 }
 0x1c1   :  { %228 = vst [vmem:[%s495_s5] sm:$0xff] %v220_v53 }

</bundles_post_ra>
